<compile_context>
chip_gen: v7x
topology: tpu7x:2x2x1
jax: 0.10.0
libtpu: 0.0.40
codegen_flags: <defaults>
</compile_context>

<pallas_src>
import functools

import jax
import jax.numpy as jnp
from jax import lax
from jax.experimental import pallas as pl
from jax.experimental.pallas import tpu as pltpu

IN_FEATURES = 5
OUT_FEATURES = 2
LANE = 128
SUBLANE = 8


def _round_up(x, m):
    return ((x + m - 1) // m) * m


def _cdiv(a, b):
    return -(-a // b)


def _vmem_capacity_bytes():
    """Physical VMEM per TensorCore; conservative fallback if query fails."""
    try:
        return int(pltpu.get_tpu_info().vmem_capacity_bytes)
    except Exception:
        return 64 << 20  # v7x per-TC size (smallest across v5e/v6e/v7x)


def _pick_batch_tile(b_pad, hp, block_rows):
    """Batch tile: multiple of 128 (lane-dense (2, TB) output blocks), sized to
    amortize the ~0.35us per-grid-step overhead while keeping the (TB, Hp) f32
    intermediates + single-buffered weights inside scoped VMEM. Ensures >= 2
    grid steps for medium/large batches so both TensorCores get work on v7x."""
    if block_rows is None:
        big_vmem = _vmem_capacity_bytes() > (96 << 20)  # v5e/v6e: 128 MiB, v7x: 64 MiB
        if hp <= 256:
            block_rows = 2048 if big_vmem else 1024
        elif hp <= 1024:
            block_rows = 512
        else:
            block_rows = 256
    if b_pad <= LANE:
        return b_pad  # single block; block dims equal the full array dims -> legal
    tb = min(block_rows, _round_up(_cdiv(b_pad, 2), LANE))
    return max(tb, LANE)


def _actor_kernel(x_ref, w1_ref, b1_ref, w2_ref, b2_ref, w3t_ref, b3_ref,
                  out_ref, *, use_bf16):
    x = x_ref[...]                                # (TB, 5)
    w1 = w1_ref[...]                              # (5, Hp)
    w2 = w2_ref[...]                              # (Hp, Hp)
    w3t = w3t_ref[...]                            # (2, Hp)
    if use_bf16:                                  # optional MXU speedup (breaks 1e-5 tol)
        x = x.astype(jnp.bfloat16)
        w1 = w1.astype(jnp.bfloat16)
        w2 = w2.astype(jnp.bfloat16)
        w3t = w3t.astype(jnp.bfloat16)

    h1 = jnp.dot(x, w1, preferred_element_type=jnp.float32) + b1_ref[...]
    h1 = jnp.maximum(h1, 0.0)                     # (TB, Hp)
    if use_bf16:
        h1 = h1.astype(jnp.bfloat16)

    h2 = jnp.dot(h1, w2, preferred_element_type=jnp.float32) + b2_ref[...]
    h2 = jnp.maximum(h2, 0.0)                     # (TB, Hp)
    if use_bf16:
        h2 = h2.astype(jnp.bfloat16)

    # Lane-dense output: contract Hp of (2, Hp) with Hp of (TB, Hp) -> (2, TB),
    # so the store is a full-lane vst instead of TB/8 masked 2-lane vst.msk.
    out = lax.dot_general(w3t, h2, (((1,), (1,)), ((), ())),
                          preferred_element_type=jnp.float32)
    out_ref[...] = (out + b3_ref[...]).astype(out_ref.dtype)   # (2, TB)


def prepare_actor_params(params):
    """One-time weight prep (call OUTSIDE the per-step jit): zero-pad the hidden
    dim to a multiple of 128 lanes (exact — padded rows/cols contribute zero
    through Linear+ReLU) and transpose layer 3 to (2, Hp) so the kernel output
    is lane-major."""
    w1, b1, w2, b2, w3, b3 = params
    h = w1.shape[1]
    hp = max(LANE, _round_up(h, LANE))
    pad = hp - h
    w1p = jnp.pad(w1, ((0, 0), (0, pad)))                       # (5, Hp)
    b1p = jnp.pad(jnp.reshape(b1, (1, h)), ((0, 0), (0, pad)))  # (1, Hp)
    w2p = jnp.pad(w2, ((0, pad), (0, pad)))                     # (Hp, Hp)
    b2p = jnp.pad(jnp.reshape(b2, (1, h)), ((0, 0), (0, pad)))  # (1, Hp)
    w3t = jnp.pad(w3.T, ((0, 0), (0, pad)))                     # (2, Hp)
    b3t = jnp.reshape(b3, (OUT_FEATURES, 1))                    # (2, 1)
    return (w1p, b1p, w2p, b2p, w3t, b3t)


@functools.partial(jax.jit, static_argnames=("block_rows", "use_bf16"))
def actor_forward(state, prepared_params, block_rows=None, use_bf16=False):
    """state: (B, 5) f32; prepared_params: output of prepare_actor_params.
    Returns (mu, sigma), each of shape (B,), matching the PyTorch Actor."""
    w1, b1, w2, b2, w3t, b3 = prepared_params
    hp = w1.shape[1]
    B = state.shape[0]

    # Pad the batch only to a sublane multiple (8). Any ragged last tile is
    # handled by Pallas boundary masking — no full-tile padding cliff.
    b_pad = _round_up(B, SUBLANE)
    if b_pad != B:
        state = jnp.pad(state, ((0, b_pad - B), (0, 0)))

    tb = _pick_batch_tile(b_pad, hp, block_rows)
    grid = (_cdiv(b_pad, tb),)

    # Explicit VMEM budget: weights once (single-buffered), activation I/O
    # blocks double-buffered, plus the (TB, Hp) f32 intermediates.
    est = (4 * (IN_FEATURES * hp + hp + hp * hp + hp + OUT_FEATURES * hp + OUT_FEATURES)
           + 2 * 4 * (tb * IN_FEATURES + OUT_FEATURES * tb)
           + 2 * 4 * tb * hp)
    vmem_limit = int(min(max(int(1.5 * est) + (8 << 20), 32 << 20),
                         _vmem_capacity_bytes()))

    def const_spec(shape):
        # Constant block index -> DMA'd once, VMEM-resident across all grid
        # steps; Buffered(1) drops the useless second buffer.
        return pl.BlockSpec(shape, lambda i: (0, 0), pipeline_mode=pl.Buffered(1))

    out = pl.pallas_call(
        functools.partial(_actor_kernel, use_bf16=use_bf16),
        out_shape=jax.ShapeDtypeStruct((OUT_FEATURES, b_pad), jnp.float32),
        grid_spec=pltpu.PrefetchScalarGridSpec(
            num_scalar_prefetch=0,
            grid=grid,
            in_specs=[
                # Activations: tiled (and pipelined / double-buffered) over batch.
                pl.BlockSpec((tb, IN_FEATURES), lambda i: (i, 0)),
                const_spec((IN_FEATURES, hp)),     # w1   (5, Hp)
                const_spec((1, hp)),               # b1   (1, Hp)
                const_spec((hp, hp)),              # w2   (Hp, Hp)
                const_spec((1, hp)),               # b2   (1, Hp)
                const_spec((OUT_FEATURES, hp)),    # w3^T (2, Hp)
                const_spec((OUT_FEATURES, 1)),     # b3   (2, 1)
            ],
            # Lane-dense output blocks: batch is the lane (last) dim.
            out_specs=pl.BlockSpec((OUT_FEATURES, tb), lambda i: (0, i)),
        ),
        compiler_params=pltpu.CompilerParams(
            dimension_semantics=("parallel",),     # shards batch across TCs on v7x
            vmem_limit_bytes=vmem_limit,
        ),
    )(state, w1, b1, w2, b2, w3t, b3)

    mu = out[0, :B]       # contiguous row slices (no strided column gather)
    sigma = out[1, :B]
    return mu, sigma


def init_actor_params(key, hidden_dim):
    """Deterministic init mimicking PyTorch nn.Linear defaults
    (uniform in [-1/sqrt(fan_in), 1/sqrt(fan_in)])."""
    ks = jax.random.split(key, 6)

    def linear(kw, kb, fan_in, fan_out):
        bound = 1.0 / jnp.sqrt(jnp.float32(fan_in))
        w = jax.random.uniform(kw, (fan_in, fan_out), jnp.float32, -bound, bound)
        b = jax.random.uniform(kb, (1, fan_out), jnp.float32, -bound, bound)
        return w, b

    w1, b1 = linear(ks[0], ks[1], IN_FEATURES, hidden_dim)
    w2, b2 = linear(ks[2], ks[3], hidden_dim, hidden_dim)
    w3, b3 = linear(ks[4], ks[5], hidden_dim, OUT_FEATURES)
    return (w1, b1, w2, b2, w3, b3)


def actor_reference(state, params):
    """Pure-JAX reference for correctness check."""
    w1, b1, w2, b2, w3, b3 = params
    h1 = jnp.maximum(state @ w1 + b1, 0.0)
    h2 = jnp.maximum(h1 @ w2 + b2, 0.0)
    out = h2 @ w3 + b3
    return out[:, 0], out[:, 1]


if __name__ == "__main__":
    key = jax.random.PRNGKey(0)
    k_params, k1, k2, k3 = jax.random.split(key, 4)

    hidden_dim = 32
    params = init_actor_params(k_params, hidden_dim)
    prepared = prepare_actor_params(params)   # hoisted: pad / transpose once

    def check(state):
        mu, sigma = actor_forward(state, prepared)
        mu = jax.block_until_ready(mu)
        sigma = jax.block_until_ready(sigma)
        mu_ref, sigma_ref = actor_reference(state, params)
        assert mu.shape == (state.shape[0],) and sigma.shape == (state.shape[0],)
        assert jnp.allclose(mu, mu_ref, atol=1e-5, rtol=1e-5)
        assert jnp.allclose(sigma, sigma_ref, atol=1e-5, rtol=1e-5)

    # Single-tile path (batch multiple of 8).
    check(jax.random.normal(k1, (8, IN_FEATURES), jnp.float32))
    # Ragged batch (exercises the row-padding-to-8 path).
    check(jax.random.normal(k2, (13, IN_FEATURES), jnp.float32))
    # Multi-tile grid with a ragged (masked) last tile.
    check(jax.random.normal(k3, (300, IN_FEATURES), jnp.float32))

    print("KERNEL_OK")
</pallas_src>

<mosaic_0001>
module attributes {stable_mosaic.version = 11 : i64} {
  func.func @_actor_kernel(%arg0: i32, %arg1: memref<8x5xf32, #tpu.memory_space<vmem>>, %arg2: memref<5x128xf32, #tpu.memory_space<vmem>>, %arg3: memref<1x128xf32, #tpu.memory_space<vmem>>, %arg4: memref<128x128xf32, #tpu.memory_space<vmem>>, %arg5: memref<1x128xf32, #tpu.memory_space<vmem>>, %arg6: memref<2x128xf32, #tpu.memory_space<vmem>>, %arg7: memref<2x1xf32, #tpu.memory_space<vmem>>, %arg8: memref<2x8xf32, #tpu.memory_space<vmem>>) attributes {dimension_semantics = [#tpu.dimension_semantics<parallel>], iteration_bounds = array<i64: 1>, scalar_prefetch = 0 : i64, scratch_operands = 0 : i64, tpu.core_type = #tpu.core_type<tc>, window_params = [{transform_indices = @transform_0, window_bounds = array<i64: 8, 5>}, {pipeline_mode = #tpu.pipeline_mode<synchronous>, transform_indices = @transform_1, window_bounds = array<i64: 5, 128>}, {pipeline_mode = #tpu.pipeline_mode<synchronous>, transform_indices = @transform_2, window_bounds = array<i64: 1, 128>}, {pipeline_mode = #tpu.pipeline_mode<synchronous>, transform_indices = @transform_3, window_bounds = array<i64: 128, 128>}, {pipeline_mode = #tpu.pipeline_mode<synchronous>, transform_indices = @transform_4, window_bounds = array<i64: 1, 128>}, {pipeline_mode = #tpu.pipeline_mode<synchronous>, transform_indices = @transform_5, window_bounds = array<i64: 2, 128>}, {pipeline_mode = #tpu.pipeline_mode<synchronous>, transform_indices = @transform_6, window_bounds = array<i64: 2, 1>}, {transform_indices = @transform_7, window_bounds = array<i64: 2, 8>}]} {
    %c0 = arith.constant 0 : index
    %c0_0 = arith.constant 0 : index
    %0 = vector.load %arg1[%c0, %c0_0] : memref<8x5xf32, #tpu.memory_space<vmem>>, vector<8x5xf32>
    %c0_1 = arith.constant 0 : index
    %c0_2 = arith.constant 0 : index
    %1 = vector.load %arg2[%c0_1, %c0_2] : memref<5x128xf32, #tpu.memory_space<vmem>>, vector<5x128xf32>
    %c0_3 = arith.constant 0 : index
    %c0_4 = arith.constant 0 : index
    %2 = vector.load %arg4[%c0_3, %c0_4] : memref<128x128xf32, #tpu.memory_space<vmem>>, vector<128x128xf32>
    %c0_5 = arith.constant 0 : index
    %c0_6 = arith.constant 0 : index
    %3 = vector.load %arg6[%c0_5, %c0_6] : memref<2x128xf32, #tpu.memory_space<vmem>>, vector<2x128xf32>
    %cst = arith.constant dense<0.000000e+00> : vector<8x128xf32>
    %4 = tpu.matmul %0, %1, %cst {dimension_numbers = #tpu.dot_dimension_numbers<[1], [0], [0], [1], [0, 0, 1, 1], [], []>} : vector<8x5xf32>, vector<5x128xf32>, vector<8x128xf32> -> vector<8x128xf32>
    %c0_7 = arith.constant 0 : index
    %c0_8 = arith.constant 0 : index
    %5 = vector.load %arg3[%c0_7, %c0_8] : memref<1x128xf32, #tpu.memory_space<vmem>>, vector<1x128xf32>
    %6 = vector.broadcast %5 : vector<1x128xf32> to vector<8x128xf32>
    %7 = arith.addf %4, %6 : vector<8x128xf32>
    %cst_9 = arith.constant 0.000000e+00 : f32
    %8 = vector.broadcast %cst_9 : f32 to vector<8x128xf32>
    %9 = arith.maximumf %7, %8 : vector<8x128xf32>
    %cst_10 = arith.constant dense<0.000000e+00> : vector<8x128xf32>
    %10 = tpu.matmul %9, %2, %cst_10 {dimension_numbers = #tpu.dot_dimension_numbers<[1], [0], [0], [1], [0, 0, 1, 1], [], []>} : vector<8x128xf32>, vector<128x128xf32>, vector<8x128xf32> -> vector<8x128xf32>
    %c0_11 = arith.constant 0 : index
    %c0_12 = arith.constant 0 : index
    %11 = vector.load %arg5[%c0_11, %c0_12] : memref<1x128xf32, #tpu.memory_space<vmem>>, vector<1x128xf32>
    %12 = vector.broadcast %11 : vector<1x128xf32> to vector<8x128xf32>
    %13 = arith.addf %10, %12 : vector<8x128xf32>
    %cst_13 = arith.constant 0.000000e+00 : f32
    %14 = vector.broadcast %cst_13 : f32 to vector<8x128xf32>
    %15 = arith.maximumf %13, %14 : vector<8x128xf32>
    %cst_14 = arith.constant dense<0.000000e+00> : vector<2x8xf32>
    %16 = tpu.matmul %3, %15, %cst_14 {dimension_numbers = #tpu.dot_dimension_numbers<[1], [1], [0], [0], [0, 0, 1, 0], [], []>} : vector<2x128xf32>, vector<8x128xf32>, vector<2x8xf32> -> vector<2x8xf32>
    %c0_15 = arith.constant 0 : index
    %c0_16 = arith.constant 0 : index
    %17 = vector.load %arg7[%c0_15, %c0_16] : memref<2x1xf32, #tpu.memory_space<vmem>>, vector<2x1xf32>
    %18 = vector.broadcast %17 : vector<2x1xf32> to vector<2x8xf32>
    %19 = arith.addf %16, %18 : vector<2x8xf32>
    %c0_17 = arith.constant 0 : index
    %c0_18 = arith.constant 0 : index
    %20 = vector.load %arg8[%c0_17, %c0_18] : memref<2x8xf32, #tpu.memory_space<vmem>>, vector<2x8xf32>
    tpu.vector_store %arg8[%c0_17, %c0_18], %19 {strides = array<i32>} : memref<2x8xf32, #tpu.memory_space<vmem>>, vector<2x8xf32>,
    return
  }
  func.func @transform_0(%arg0: i32) -> (i32, i32) {
    %c0_i32 = arith.constant 0 : i32
    %c0_i32_0 = arith.constant 0 : i32
    return %arg0, %c0_i32 : i32, i32
  }
  func.func @transform_1(%arg0: i32) -> (i32, i32) {
    %c0_i32 = arith.constant 0 : i32
    %c0_i32_0 = arith.constant 0 : i32
    %c0_i32_1 = arith.constant 0 : i32
    return %c0_i32, %c0_i32_0 : i32, i32
  }
  func.func @transform_2(%arg0: i32) -> (i32, i32) {
    %c0_i32 = arith.constant 0 : i32
    %c0_i32_0 = arith.constant 0 : i32
    %c0_i32_1 = arith.constant 0 : i32
    return %c0_i32, %c0_i32_0 : i32, i32
  }
  func.func @transform_3(%arg0: i32) -> (i32, i32) {
    %c0_i32 = arith.constant 0 : i32
    %c0_i32_0 = arith.constant 0 : i32
    %c0_i32_1 = arith.constant 0 : i32
    return %c0_i32, %c0_i32_0 : i32, i32
  }
  func.func @transform_4(%arg0: i32) -> (i32, i32) {
    %c0_i32 = arith.constant 0 : i32
    %c0_i32_0 = arith.constant 0 : i32
    %c0_i32_1 = arith.constant 0 : i32
    return %c0_i32, %c0_i32_0 : i32, i32
  }
  func.func @transform_5(%arg0: i32) -> (i32, i32) {
    %c0_i32 = arith.constant 0 : i32
    %c0_i32_0 = arith.constant 0 : i32
    %c0_i32_1 = arith.constant 0 : i32
    return %c0_i32, %c0_i32_0 : i32, i32
  }
  func.func @transform_6(%arg0: i32) -> (i32, i32) {
    %c0_i32 = arith.constant 0 : i32
    %c0_i32_0 = arith.constant 0 : i32
    %c0_i32_1 = arith.constant 0 : i32
    return %c0_i32, %c0_i32_0 : i32, i32
  }
  func.func @transform_7(%arg0: i32) -> (i32, i32) {
    %c0_i32 = arith.constant 0 : i32
    %c0_i32_0 = arith.constant 0 : i32
    return %c0_i32, %arg0 : i32, i32
  }
}

</mosaic_0001>

<bundles_post_ra>
// kernel: actor_forward.1
= control target key start
LH: loop header
LB: loop body
LE: loop exit
PB: predicated region body
PF: predicated region fallthrough
CT: control target
= control target key end

     0   :  { %12 = vsyncpa [#allocation3], 0  ;;  %s607_s0 = inlined_call_operand.hbm [shape: f32[8,5], index: 0, kind: input, shape index: {}]   ;;  %s608_s1 = inlined_call_operand.hbm [shape: f32[5,128], index: 1, kind: input, shape index: {}]   ;;  %s609_s2 = inlined_call_operand.vmem [shape: f32[1,128], index: 2, kind: input, shape index: {}]   ;;  %s610_s3 = inlined_call_operand.hbm [shape: f32[128,128], index: 3, kind: input, shape index: {}]   ;;  %s611_s4 = inlined_call_operand.vmem [shape: f32[1,128], index: 4, kind: input, shape index: {}]   ;;  %s612_s5 = inlined_call_operand.vmem [shape: f32[2,128], index: 5, kind: input, shape index: {}]   ;;  %s613_s6 = inlined_call_operand.vmem [shape: f32[2,1], index: 6, kind: input, shape index: {}]   ;;  %s614_s7 = inlined_call_operand.vmem [shape: f32[2,8], index: 7, kind: output, shape index: {}]  }
   0x1   :  { %13 = vsyncpa [#allocation5], 0  ;;  %s504_s24 = smov [#allocation4]   ;;  %s505_s26 = smov [#allocation2]  }
   0x2   :  { %s30_s25 = sshll.u32 %s504_s24, 4  ;;  %s20_s27 = sshll.u32 %s505_s26, 4  ;;  %s31_s25 = int_to_ptr.vmem [resolvable:$true] %s30_s25  ;;  %s21_s27 = int_to_ptr.vmem [resolvable:$true] %s20_s27 }
   0x3   :  { %s434_s30 = scalar_lea.hbm %s608_s1, 128 }
   0x4   :  { %p435_p0 = scmp.ne.s32.totalorder %s608_s1, %s434_s30  ;;  %p438_p1 = scmp.lt.u32.totalorder %s434_s30, %s608_s1 }
   0x6   :  { %p440_p2 = pnand %p438_p1, %p435_p0 }
   0x8   :  { %443 = shalt.err (!%p440_p2)
}
   0x9   :  { %s444_s12 = scalar_lea.vmem %s31_s25, 128  ;;  %p449_p4 = scmp.lt.s32.totalorder %s31_s25, %s31_s25 }
   0xa   :  { %p445_p3 = scmp.ne.s32.totalorder %s31_s25, %s444_s12  ;;  %p450_p5 = scmp.lt.s32.totalorder %s444_s12, %s444_s12 }
   0xc   :  { %p451_p6 = por %p450_p5, %p449_p4 }
   0xe   :  { %p452_p7 = pnand %p451_p6, %p445_p3 }
  0x10   :  { %455 = shalt.err (!%p452_p7)
}
  0x11   :  { %33 = dma.hbm_to_vmem [thread:$0]  %s608_s1, 128, %s31_s25, [#allocation5]  }
  0x12   :  { %s456_s17 = scalar_lea.hbm %s607_s0, 128 }
  0x13   :  { %p457_p8 = scmp.ne.s32.totalorder %s607_s0, %s456_s17  ;;  %p460_p9 = scmp.lt.u32.totalorder %s456_s17, %s607_s0 }
  0x15   :  { %p462_p10 = pnand %p460_p9, %p457_p8 }
  0x17   :  { %465 = shalt.err (!%p462_p10)
}
  0x18   :  { %s466_s22 = scalar_lea.vmem %s21_s27, 128  ;;  %p471_p12 = scmp.lt.s32.totalorder %s21_s27, %s21_s27 }
  0x19   :  { %p467_p11 = scmp.ne.s32.totalorder %s21_s27, %s466_s22  ;;  %p472_p13 = scmp.lt.s32.totalorder %s466_s22, %s466_s22 }
  0x1b   :  { %p473_p0 = por %p472_p13, %p471_p12 }
  0x1d   :  { %p474_p1 = pnand %p473_p0, %p467_p11 }
  0x1f   :  { %477 = shalt.err (!%p474_p1)
}
  0x20   :  { %23 = dma.hbm_to_vmem [thread:$0]  %s607_s0, 128, %s21_s27, [#allocation3]  }
  0x21   :  { %s506_s24 = smov [#allocation6]   ;;  %s478_s29 = scalar_lea.hbm %s610_s3, 2048 }
  0x22   :  { %s41_s25 = sshll.u32 %s506_s24, 4  ;;  %p479_p2 = scmp.ne.s32.totalorder %s610_s3, %s478_s29  ;;  %s42_s25 = int_to_ptr.vmem [resolvable:$true] %s41_s25 }
  0x23   :  { %p482_p3 = scmp.lt.u32.totalorder %s478_s29, %s610_s3 }
  0x25   :  { %p484_p4 = pnand %p482_p3, %p479_p2 }
  0x27   :  { %487 = shalt.err (!%p484_p4)
}
  0x28   :  { %s488_s11 = scalar_lea.vmem %s42_s25, 2048  ;;  %p493_p6 = scmp.lt.s32.totalorder %s42_s25, %s42_s25 }
  0x29   :  { %p489_p5 = scmp.ne.s32.totalorder %s42_s25, %s488_s11  ;;  %p494_p7 = scmp.lt.s32.totalorder %s488_s11, %s488_s11 }
  0x2b   :  { %p495_p8 = por %p494_p7, %p493_p6 }
  0x2d   :  { %p496_p9 = pnand %p495_p8, %p489_p5 }
  0x2f   :  { %499 = shalt.err (!%p496_p9)
}
  0x30   :  { %s507_s0 = smov 128   ;;  %s508_s27 = smov 8  }
  0x31   :  { %47 = dma.hbm_to_vmem [thread:$0]  %s610_s3, 2048, %s42_s25, [#allocation5], %s507_s0, %s507_s0, %s508_s27  }
  0x32   :  { %500 = dma.done.wait [#allocation3], 128  }
  0x33   :  { %501 = vsyncadd [#allocation3], 4294967168 }
  0x34   :  { %502 = dma.done.wait [#allocation5], 2176  }
  0x35   :  { %503 = vsyncadd [#allocation5], 4294965120  ;;  %v509_v0 = vmov 0.0   ;;  %vm510_vm0 = vmmov 0   ;;  %v511_v1 = vmov 0.0|0.0   ;;  %vm93_vm1 = vcmask 1044480  }
  0x36   :  { %355 = vmatprep.subr.mxu0 %v509_v0  ;;  %357 = vmatprep.mubr.msk.f32.mxu0 %vm510_vm0, %v509_v0  ;;  %vm89_vm2 = vcmask 39936   ;;  %v64_v2 = vld [vmem:[#allocation4] sm:$0x1f]  ;;  %v63_v3 = vld [vmem:[#allocation2] sm:$0xff]  ;;  %v65_v4 = vld [vmem:[#allocation6] sm:$0xff]  ;;  %v512_v34 = vmov 0  }
  0x37   :  { %400 = vmatprep.subr.bf16.mxu1 %v511_v1  ;;  %392 = vmatprep.mubr.msk.f32.mxu1 %vm510_vm0, %v509_v0  ;;  %v66_v5 = vld [vmem:[#allocation6 + $0x8] sm:$0xff]  ;;  %v67_v6 = vld [vmem:[#allocation6 + $0x10] sm:$0xff]  ;;  %v68_v7 = vld [vmem:[#allocation6 + $0x18] sm:$0xff]  ;;  %vm322_vm3 = vcmask 58368  }
  0x38   :  { %356 = vmatpush3.msk.msra.mxu0 %vm93_vm1, %v64_v2  ;;  %v401_v8 = vpack.c.bf16 %v66_v5, %v65_v4  ;;  %v404_v9 = vpack.c.bf16 %v68_v7, %v67_v6  ;;  %v69_v10 = vld [vmem:[#allocation6 + $0x20] sm:$0xff]  ;;  %v70_v11 = vld [vmem:[#allocation6 + $0x28] sm:$0xff]  ;;  %v71_v13 = vld [vmem:[#allocation6 + $0x30] sm:$0xff]  ;;  %433 = vset.pattern.permute.xlu0 %v512_v34 }
  0x39   :  { %358 = vmatmul.mubr.msk.f32.vlgmr.msra.gmra.mrb[0].mxu0 %vm89_vm2, %v63_v3  ;;  %395 = vmatprep.subr.mxu0 %v509_v0  ;;  %v407_v12 = vpack.c.bf16 %v70_v11, %v69_v10  ;;  %v72_v14 = vld [vmem:[#allocation6 + $0x38] sm:$0xff]  ;;  %v73_v16 = vld [vmem:[#allocation6 + $0x40] sm:$0xff]  ;;  %v74_v17 = vld [vmem:[#allocation6 + $0x48] sm:$0xff] }
  0x3a   :  { %397 = vmatprep.mubr.msk.f32.mxu0 %vm510_vm0, %v509_v0  ;;  %402 = vmatpush3.bf16.msra.mxu1 %v401_v8  ;;  %v410_v15 = vpack.c.bf16 %v72_v14, %v71_v13  ;;  %v413_v18 = vpack.c.bf16 %v74_v17, %v73_v16  ;;  %v75_v19 = vld [vmem:[#allocation6 + $0x50] sm:$0xff]  ;;  %v76_v20 = vld [vmem:[#allocation6 + $0x58] sm:$0xff]  ;;  %v77_v22 = vld [vmem:[#allocation6 + $0x60] sm:$0xff] }
  0x3b   :  { %403 = vmatprep.subr.bf16.mxu1 %v511_v1  ;;  %v416_v21 = vpack.c.bf16 %v76_v20, %v75_v19  ;;  %v78_v23 = vld [vmem:[#allocation6 + $0x68] sm:$0xff]  ;;  %v79_v25 = vld [vmem:[#allocation6 + $0x70] sm:$0xff]  ;;  %v80_v26 = vld [vmem:[#allocation6 + $0x78] sm:$0xff] }
  0x3c   :  { %v419_v24 = vpack.c.bf16 %v78_v23, %v77_v22  ;;  %v422_v27 = vpack.c.bf16 %v80_v26, %v79_v25  ;;  %v330_v28 = vld [vmem:[%s609_s2] ss:$0 sm:$0xff] }
  0x3d   :  { %v246_v33 = vld [vmem:[%s613_s6] sm:$0x3] }
  0x3e   :  { %405 = vmatpush3.bf16.msra.mxu1 %v404_v9  ;;  %249 = vperm.xlu0 %433, %v246_v33   ;;  %v333_v35 = vld [vmem:[%s611_s4] ss:$0 sm:$0xff] }
  0x3f   :  { %406 = vmatprep.subr.bf16.mxu1 %v511_v1  ;;  %v81_v40 = vld [vmem:[%s612_s5] sm:$0x3] }
  0x42   :  { %408 = vmatpush3.bf16.msra.mxu1 %v407_v12 }
  0x43   :  { %409 = vmatprep.subr.bf16.mxu1 %v511_v1 }
  0x46   :  { %411 = vmatpush3.bf16.msra.mxu1 %v410_v15 }
  0x47   :  { %412 = vmatprep.subr.bf16.mxu1 %v511_v1 }
  0x4a   :  { %414 = vmatpush3.bf16.msra.mxu1 %v413_v18 }
  0x4b   :  { %415 = vmatprep.subr.bf16.mxu1 %v511_v1 }
  0x4e   :  { %417 = vmatpush3.bf16.msra.mxu1 %v416_v21 }
  0x4f   :  { %418 = vmatprep.subr.bf16.mxu1 %v511_v1 }
  0x52   :  { %420 = vmatpush3.bf16.msra.mxu1 %v419_v24 }
  0x53   :  { %421 = vmatprep.subr.bf16.mxu1 %v511_v1 }
  0x56   :  { %423 = vmatpush3.bf16.msra.mxu1 %v422_v27 }
  0xbd   :  { %v250_v41 = vpop.permute.xlu0 %249 }
 0x10c   :  { %v163_v29 = vpop.f32.mrb[0].mxu0 }
 0x10d   :  { %v164_v30 = vadd.f32 %v330_v28, %v163_v29  ;;  %v359_v31 = vpop.f32.mrb[1].mxu0 }
 0x10f   :  { %v167_v32 = vmax.f32 %v164_v30, 0.0 }
 0x111   :  { %393 = vmatmul.mubr.f32.vlgmr.msra.gmra.mrb[0].mxu1 %v167_v32 }
 0x1e4   :  { %v241_v36 = vpop.f32.mrb[0].mxu1 }
 0x1e5   :  { %v242_v37 = vadd.f32 %v333_v35, %v241_v36  ;;  %v394_v38 = vpop.f32.mrb[1].mxu1 }
 0x1e7   :  { %v245_v39 = vmax.f32 %v242_v37, 0.0 }
 0x1e9   :  { %396 = vmatpush3.xpose.msra.mxu0 %v245_v39 }
 0x1ec   :  { %398 = vmatmul.mubr.f32.vlgmr.msra.gmra.mrb[2].mxu0 %v81_v40 }
 0x2bf   :  { %v318_v42 = vpop.f32.mrb[2].mxu0 }
 0x2c0   :  { %v319_v43 = vadd.f32 %v318_v42, %v250_v41  ;;  %v399_v44 = vpop.f32.mrb[3].mxu0 }
 0x2c2   :  { %323 = vst.msk [vmem:[%s614_s7] sm:$0x3] %vm322_vm3, %v319_v43 }
 0x2c3   :  { %328 = vsyncpa [#allocation3], 1 }
 0x2c4   :  { %329 = vsyncpa [#allocation5], 1 }

</bundles_post_ra>
